<compile_context>
chip_gen: v5e
topology: v5e:2x2
jax: 0.10.0
libtpu: 0.0.40
codegen_flags: <defaults>
</compile_context>

<pallas_src>
import functools
import math

import jax
import jax.numpy as jnp
from jax.experimental import pallas as pl
from jax.experimental.pallas import tpu as pltpu

BN_EPS = 1e-5          # nn.BatchNorm1d default eps
HYPERBOLIC_DIM = 5


def _round_up(n, m):
    return ((n + m - 1) // m) * m


# ---------------------------------------------------------------------------
# Pallas kernel
# ---------------------------------------------------------------------------
def _multihead_kernel(n_main, latent, *refs):
    """refs = [inv_c(SMEM), x, ts,
               first(W,b), main_0(W,b), ..., main_{n_main-1}(W,b),
               branch_w, branch_b, wt0, wt1, head_w, head_b, out]"""
    it = iter(refs)
    inv_c_ref = next(it)
    x_ref = next(it)
    ts_ref = next(it)
    w1_ref, b1_ref = next(it), next(it)
    mains = [(next(it), next(it)) for _ in range(n_main)]
    wb_ref, bb_ref = next(it), next(it)          # fused branch weight / bias
    wt0_ref, wt1_ref = next(it), next(it)        # zero-padded timestep rows
    wh_ref, bh_ref = next(it), next(it)          # fused block-diagonal head
    out_ref = next(it)

    def dot(a, w_ref):
        w = w_ref[...]                           # weights pre-cast (bf16 or f32)
        return jnp.dot(a.astype(w.dtype), w, preferred_element_type=jnp.float32)

    # ---- shared trunk: first_layer + main_layers (Linear + folded BN + ReLU)
    h = jnp.maximum(dot(x_ref[...], w1_ref) + b1_ref[...], 0.0)
    for w_r, b_r in mains:
        h = jnp.maximum(dot(h, w_r) + b_r[...], 0.0)

    # ---- fused branch matmul: [spline_layer | hyper_layer.Wx] in one MXU pass.
    # Timestep contribution = two full-width rank-1 VPU adds (spline half is zero).
    # TODO(synk): measure the alternative of folding ts into the MXU matmul (K = hidden+2).
    ts = ts_ref[...]                                                 # (TB, 2)
    z = (dot(h, wb_ref) + bb_ref[...]
         + ts[:, 0:1] * wt0_ref[...]
         + ts[:, 1:2] * wt1_ref[...])                                # (TB, 2H)
    a = jnp.maximum(z, 0.0)

    # ---- fused block-diagonal head -> merged (TB, latent+hdim) slab
    y = dot(a, wh_ref) + bh_ref[...]

    # ---- LearnableLorentzModel.projx, in place on the slab:
    # x0 = sqrt(1/c + ||hyper_spatial||^2) written at column `latent`; spline columns
    # (< latent) and hyper spatial columns (> latent) pass through unchanged.
    col = jax.lax.broadcasted_iota(jnp.int32, y.shape, 1)
    sumsq = jnp.sum(jnp.where(col > latent, y * y, 0.0), axis=-1, keepdims=True)
    x0 = jnp.sqrt(inv_c_ref[0, 0] + sumsq)                           # (TB, 1)
    out_ref[...] = jnp.where(col == latent, x0, y).astype(out_ref.dtype)


# ---------------------------------------------------------------------------
# Wrapper
# ---------------------------------------------------------------------------
def multihead_forward(x, timesteps, fused, *, block_b=2048):
    """fused: output of fuse_params().  Returns (spline_out, hyperbolic_out)."""
    n_main = len(fused["main"])
    B, n_features = x.shape
    latent = fused["latent"]
    hdim = fused["hdim"]
    out_w = latent + hdim

    # Batch tile: keep >= 2 grid steps when B > 8 (so both v7x TensorCores get work),
    # sublane(8)-aligned, capped at block_b (amortizes the ~0.35us/step overhead and
    # stays within v7x's smaller 64 MiB per-TC VMEM at the default 32 MiB limit).
    if B <= 8:
        TB = B
    else:
        TB = max(8, min(block_b, _round_up(pl.cdiv(B, 2), 8)))
    grid = (pl.cdiv(B, TB),)

    flat = [fused["inv_c"], x, timesteps]
    in_specs = [
        pl.BlockSpec(memory_space=pltpu.MemorySpace.SMEM),           # inv_c scalar
        pl.BlockSpec((TB, n_features), lambda i: (i, 0)),            # x tile
        pl.BlockSpec((TB, 2), lambda i: (i, 0)),                     # timesteps tile
    ]

    def resident(a):
        # Weights/biases: full block, constant index_map -> pinned in VMEM.
        flat.append(a)
        in_specs.append(pl.BlockSpec(a.shape, lambda i: (0, 0)))

    for a in fused["first"]:
        resident(a)
    for lyr in fused["main"]:
        for a in lyr:
            resident(a)
    for name in ("branch_w", "branch_b", "wt0", "wt1", "head_w", "head_b"):
        resident(fused[name])

    # Advisory cost estimate so XLA can overlap this small kernel with neighbors.
    mm_shapes = ([fused["first"][0].shape]
                 + [lyr[0].shape for lyr in fused["main"]]
                 + [fused["branch_w"].shape, fused["head_w"].shape])
    flops = 2 * B * sum(int(m) * int(n) for m, n in mm_shapes)
    param_bytes = sum(int(a.size) * a.dtype.itemsize for a in flat[3:])
    bytes_accessed = param_bytes + B * (n_features + 2 + out_w) * 4

    out = pl.pallas_call(
        functools.partial(_multihead_kernel, n_main, latent),
        out_shape=jax.ShapeDtypeStruct((B, out_w), jnp.float32),
        grid=grid,
        in_specs=in_specs,
        out_specs=pl.BlockSpec((TB, out_w), lambda i: (i, 0)),
        compiler_params=pltpu.CompilerParams(
            dimension_semantics=("parallel",),      # shards batch over v7x's 2 TCs
            vmem_limit_bytes=32 * 1024 * 1024,      # safe on v7x's 64 MiB per-TC VMEM
        ),
        cost_estimate=pl.CostEstimate(
            flops=flops, transcendentals=B, bytes_accessed=bytes_accessed),
    )(*flat)

    return out[:, :latent], out[:, latent:]


# ---------------------------------------------------------------------------
# One-time parameter fusion (outside the hot path)
# ---------------------------------------------------------------------------
def fuse_params(params, matmul_dtype=jnp.bfloat16):
    """Fold eval-mode BatchNorm1d into the preceding Linear, fuse the two branch
    matmuls and the two head matmuls, pre-cast weights to matmul_dtype (biases and
    accumulation stay f32), and precompute inv_c."""
    def fold(W, b, g, be, m, v):
        scale = g / jnp.sqrt(v + BN_EPS)                  # (1, n)
        return W * scale, (b - m) * scale + be

    def wcast(W):
        return W.astype(matmul_dtype) if matmul_dtype is not None else W

    Wf, bf = fold(*params["first"])
    fused = {"first": (wcast(Wf), bf)}
    fused["main"] = [(wcast(W), b) for (W, b) in (fold(*lyr) for lyr in params["main"])]

    # Branch fusion: [spline_layer W | hyper_layer Wx] -> (hidden, 2H)
    Ws, bs = fold(*params["spline_layer"])
    Wx, Wt, b, g, be, m, v = params["hyper_layer"]
    scale = g / jnp.sqrt(v + BN_EPS)
    Wh_ = Wx * scale
    bh_ = (b - m) * scale + be
    Wt_f = Wt * scale                                     # (2, H)
    H = Ws.shape[1]
    fused["branch_w"] = wcast(jnp.concatenate([Ws, Wh_], axis=1))      # (hidden, 2H)
    fused["branch_b"] = jnp.concatenate([bs, bh_], axis=1)             # (1, 2H)
    zeros_h = jnp.zeros((1, H), jnp.float32)
    fused["wt0"] = jnp.concatenate([zeros_h, Wt_f[0:1, :]], axis=1)    # (1, 2H)
    fused["wt1"] = jnp.concatenate([zeros_h, Wt_f[1:2, :]], axis=1)    # (1, 2H)

    # Head fusion: block-diagonal (2H, latent + hdim)
    Wsh, bsh = params["spline_head"]                      # (H, latent)
    Whh, bhh = params["hyper_head"]                       # (H, hdim)
    latent, hdim = Wsh.shape[1], Whh.shape[1]
    Whead = jnp.zeros((2 * H, latent + hdim), jnp.float32)
    Whead = Whead.at[:H, :latent].set(Wsh).at[H:, latent:].set(Whh)
    fused["head_w"] = wcast(Whead)
    fused["head_b"] = jnp.concatenate([bsh, bhh], axis=1)

    # inv_c = 1 / exp(clamp(log_c, -10, 10)), per LearnableLorentzModel
    fused["inv_c"] = jnp.exp(-jnp.clip(params["log_c"], -10.0, 10.0))  # (1, 1)
    fused["latent"] = latent
    fused["hdim"] = hdim
    return fused


# ---------------------------------------------------------------------------
# Deterministic synthetic parameter initialization (shapes per __init__)
# ---------------------------------------------------------------------------
def init_params(key, n_features, hidden_sizes, n_basis, dynamic_bias=False,
                hyperbolic_dim=HYPERBOLIC_DIM):
    def linear(k, fan_in, fan_out):
        k1, k2 = jax.random.split(k)
        lim = 1.0 / math.sqrt(fan_in)
        W = jax.random.uniform(k1, (fan_in, fan_out), jnp.float32, -lim, lim)
        b = jax.random.uniform(k2, (1, fan_out), jnp.float32, -lim, lim)
        return W, b

    def bn(k, n):
        k1, k2, k3, k4 = jax.random.split(k, 4)
        g = jax.random.uniform(k1, (1, n), jnp.float32, 0.5, 1.5)
        be = 0.1 * jax.random.normal(k2, (1, n), jnp.float32)
        m = 0.1 * jax.random.normal(k3, (1, n), jnp.float32)
        v = jax.random.uniform(k4, (1, n), jnp.float32, 0.5, 1.5)
        return g, be, m, v

    n_main = len(hidden_sizes) - 2
    latent = n_basis + (1 if dynamic_bias else 0)
    keys = iter(jax.random.split(key, 2 * (n_main + 4) + 2))

    params = {"log_c": jnp.zeros((1, 1), jnp.float32)}    # log(1.0) -> c = 1.0

    W, b = linear(next(keys), n_features, hidden_sizes[0])
    params["first"] = (W, b, *bn(next(keys), hidden_sizes[0]))

    params["main"] = []
    for i in range(n_main):
        W, b = linear(next(keys), hidden_sizes[i], hidden_sizes[i + 1])
        params["main"].append((W, b, *bn(next(keys), hidden_sizes[i + 1])))

    W, b = linear(next(keys), hidden_sizes[-2], hidden_sizes[-1])
    params["spline_layer"] = (W, b, *bn(next(keys), hidden_sizes[-1]))

    # hyper_layer takes concat([hidden, timesteps]) of width hidden_sizes[-2] + 2;
    # store its weight pre-split into Wx (hidden part) and Wt (timestep part, 2 rows).
    W, b = linear(next(keys), hidden_sizes[-2] + 2, hidden_sizes[-1])
    Wx, Wt = W[: hidden_sizes[-2]], W[hidden_sizes[-2]:]
    params["hyper_layer"] = (Wx, Wt, b, *bn(next(keys), hidden_sizes[-1]))

    params["spline_head"] = linear(next(keys), hidden_sizes[-1], latent)
    params["hyper_head"] = linear(next(keys), hidden_sizes[-1], hyperbolic_dim)
    return params


# ---------------------------------------------------------------------------
# Pure-JAX reference (unfused, eval-mode; for numerical check)
# ---------------------------------------------------------------------------
def reference_forward(x, ts, params):
    def block(h, p):
        W, b, g, be, m, v = p
        y = h @ W + b
        return jnp.maximum((y - m) / jnp.sqrt(v + BN_EPS) * g + be, 0.0)

    h = block(x, params["first"])
    for lyr in params["main"]:
        h = block(h, lyr)

    hs = block(h, params["spline_layer"])
    Ws, bs = params["spline_head"]
    s = hs @ Ws + bs

    Wx, Wt, b, g, be, m, v = params["hyper_layer"]
    y = h @ Wx + ts @ Wt + b
    hh = jnp.maximum((y - m) / jnp.sqrt(v + BN_EPS) * g + be, 0.0)
    Wh, bh = params["hyper_head"]
    hy = hh @ Wh + bh

    c = jnp.exp(jnp.clip(params["log_c"], -10.0, 10.0))
    spatial = hy[:, 1:]
    x0 = jnp.sqrt(1.0 / c + jnp.sum(spatial * spatial, axis=-1, keepdims=True))
    return s, jnp.concatenate([x0, spatial], axis=-1)


if __name__ == "__main__":
    key = jax.random.PRNGKey(0)
    B, n_features, n_basis = 8, 16, 9
    hidden_sizes = [32, 32, 32]

    kx, kt, kp = jax.random.split(key, 3)
    x = jax.random.normal(kx, (B, n_features), jnp.float32)
    timesteps = jax.random.uniform(kt, (B, 2), jnp.float32)
    params = init_params(kp, n_features, hidden_sizes, n_basis)
    s_ref, h_ref = reference_forward(x, timesteps, params)

    # f32 matmul path: tight semantic check against the PyTorch (eval-mode) reference.
    fused_f32 = fuse_params(params, matmul_dtype=None)
    s, h = multihead_forward(x, timesteps, fused_f32)
    jax.block_until_ready((s, h))
    assert s.shape == (B, n_basis) and h.shape == (B, HYPERBOLIC_DIM)
    assert jnp.allclose(s, s_ref, atol=1e-4, rtol=1e-4)
    assert jnp.allclose(h, h_ref, atol=1e-4, rtol=1e-4)

    # bf16 matmul operands (default production path): full-rate MXU, f32 accumulation;
    # validated with a correspondingly looser tolerance.
    fused_bf16 = fuse_params(params)
    sb, hb = multihead_forward(x, timesteps, fused_bf16)
    jax.block_until_ready((sb, hb))
    assert jnp.allclose(sb, s_ref, atol=1e-1, rtol=1e-1)
    assert jnp.allclose(hb, h_ref, atol=1e-1, rtol=1e-1)

    # Multi-step grid (>=2 steps) + ragged final batch tile (B not a tile multiple).
    B2 = 20
    kx2, kt2 = jax.random.split(jax.random.PRNGKey(1))
    x2 = jax.random.normal(kx2, (B2, n_features), jnp.float32)
    ts2 = jax.random.uniform(kt2, (B2, 2), jnp.float32)
    s2, h2 = multihead_forward(x2, ts2, fused_f32)
    jax.block_until_ready((s2, h2))
    s2_ref, h2_ref = reference_forward(x2, ts2, params)
    assert jnp.allclose(s2, s2_ref, atol=1e-4, rtol=1e-4)
    assert jnp.allclose(h2, h2_ref, atol=1e-4, rtol=1e-4)

    print("KERNEL_OK")
</pallas_src>

<mosaic_0001>
module attributes {stable_mosaic.version = 11 : i64} {
  func.func @_multihead_kernel(%arg0: i32, %arg1: memref<1x1xf32, #tpu.memory_space<smem>>, %arg2: memref<8x16xf32, #tpu.memory_space<vmem>>, %arg3: memref<8x2xf32, #tpu.memory_space<vmem>>, %arg4: memref<16x32xf32, #tpu.memory_space<vmem>>, %arg5: memref<1x32xf32, #tpu.memory_space<vmem>>, %arg6: memref<32x32xf32, #tpu.memory_space<vmem>>, %arg7: memref<1x32xf32, #tpu.memory_space<vmem>>, %arg8: memref<32x64xf32, #tpu.memory_space<vmem>>, %arg9: memref<1x64xf32, #tpu.memory_space<vmem>>, %arg10: memref<1x64xf32, #tpu.memory_space<vmem>>, %arg11: memref<1x64xf32, #tpu.memory_space<vmem>>, %arg12: memref<64x14xf32, #tpu.memory_space<vmem>>, %arg13: memref<1x14xf32, #tpu.memory_space<vmem>>, %arg14: memref<8x14xf32, #tpu.memory_space<vmem>>) attributes {dimension_semantics = [#tpu.dimension_semantics<parallel>], iteration_bounds = array<i64: 1>, scalar_prefetch = 0 : i64, scratch_operands = 0 : i64, tpu.core_type = #tpu.core_type<tc>, window_params = [{transform_indices = @transform_0, window_bounds = array<i64: 1, 1>}, {transform_indices = @transform_1, window_bounds = array<i64: 8, 16>}, {transform_indices = @transform_2, window_bounds = array<i64: 8, 2>}, {pipeline_mode = #tpu.pipeline_mode<synchronous>, transform_indices = @transform_3, window_bounds = array<i64: 16, 32>}, {pipeline_mode = #tpu.pipeline_mode<synchronous>, transform_indices = @transform_4, window_bounds = array<i64: 1, 32>}, {pipeline_mode = #tpu.pipeline_mode<synchronous>, transform_indices = @transform_5, window_bounds = array<i64: 32, 32>}, {pipeline_mode = #tpu.pipeline_mode<synchronous>, transform_indices = @transform_6, window_bounds = array<i64: 1, 32>}, {pipeline_mode = #tpu.pipeline_mode<synchronous>, transform_indices = @transform_7, window_bounds = array<i64: 32, 64>}, {pipeline_mode = #tpu.pipeline_mode<synchronous>, transform_indices = @transform_8, window_bounds = array<i64: 1, 64>}, {pipeline_mode = #tpu.pipeline_mode<synchronous>, transform_indices = @transform_9, window_bounds = array<i64: 1, 64>}, {pipeline_mode = #tpu.pipeline_mode<synchronous>, transform_indices = @transform_10, window_bounds = array<i64: 1, 64>}, {pipeline_mode = #tpu.pipeline_mode<synchronous>, transform_indices = @transform_11, window_bounds = array<i64: 64, 14>}, {pipeline_mode = #tpu.pipeline_mode<synchronous>, transform_indices = @transform_12, window_bounds = array<i64: 1, 14>}, {transform_indices = @transform_13, window_bounds = array<i64: 8, 14>}]} {
    %c0 = arith.constant 0 : index
    %c0_0 = arith.constant 0 : index
    %0 = vector.load %arg2[%c0, %c0_0] : memref<8x16xf32, #tpu.memory_space<vmem>>, vector<8x16xf32>
    %c0_1 = arith.constant 0 : index
    %c0_2 = arith.constant 0 : index
    %1 = vector.load %arg4[%c0_1, %c0_2] : memref<16x32xf32, #tpu.memory_space<vmem>>, vector<16x32xf32>
    %cst = arith.constant dense<0.000000e+00> : vector<8x32xf32>
    %2 = tpu.matmul %0, %1, %cst {dimension_numbers = #tpu.dot_dimension_numbers<[1], [0], [0], [1], [0, 0, 1, 1], [], []>} : vector<8x16xf32>, vector<16x32xf32>, vector<8x32xf32> -> vector<8x32xf32>
    %c0_3 = arith.constant 0 : index
    %c0_4 = arith.constant 0 : index
    %3 = vector.load %arg5[%c0_3, %c0_4] : memref<1x32xf32, #tpu.memory_space<vmem>>, vector<1x32xf32>
    %4 = vector.broadcast %3 : vector<1x32xf32> to vector<8x32xf32>
    %5 = arith.addf %2, %4 : vector<8x32xf32>
    %cst_5 = arith.constant 0.000000e+00 : f32
    %6 = vector.broadcast %cst_5 : f32 to vector<8x32xf32>
    %7 = arith.maximumf %5, %6 : vector<8x32xf32>
    %c0_6 = arith.constant 0 : index
    %c0_7 = arith.constant 0 : index
    %8 = vector.load %arg6[%c0_6, %c0_7] : memref<32x32xf32, #tpu.memory_space<vmem>>, vector<32x32xf32>
    %cst_8 = arith.constant dense<0.000000e+00> : vector<8x32xf32>
    %9 = tpu.matmul %7, %8, %cst_8 {dimension_numbers = #tpu.dot_dimension_numbers<[1], [0], [0], [1], [0, 0, 1, 1], [], []>} : vector<8x32xf32>, vector<32x32xf32>, vector<8x32xf32> -> vector<8x32xf32>
    %c0_9 = arith.constant 0 : index
    %c0_10 = arith.constant 0 : index
    %10 = vector.load %arg7[%c0_9, %c0_10] : memref<1x32xf32, #tpu.memory_space<vmem>>, vector<1x32xf32>
    %11 = vector.broadcast %10 : vector<1x32xf32> to vector<8x32xf32>
    %12 = arith.addf %9, %11 : vector<8x32xf32>
    %cst_11 = arith.constant 0.000000e+00 : f32
    %13 = vector.broadcast %cst_11 : f32 to vector<8x32xf32>
    %14 = arith.maximumf %12, %13 : vector<8x32xf32>
    %c0_12 = arith.constant 0 : index
    %c0_13 = arith.constant 0 : index
    %15 = vector.load %arg3[%c0_12, %c0_13] : memref<8x2xf32, #tpu.memory_space<vmem>>, vector<8x2xf32>
    %c0_14 = arith.constant 0 : index
    %c0_15 = arith.constant 0 : index
    %16 = vector.load %arg8[%c0_14, %c0_15] : memref<32x64xf32, #tpu.memory_space<vmem>>, vector<32x64xf32>
    %cst_16 = arith.constant dense<0.000000e+00> : vector<8x64xf32>
    %17 = tpu.matmul %14, %16, %cst_16 {dimension_numbers = #tpu.dot_dimension_numbers<[1], [0], [0], [1], [0, 0, 1, 1], [], []>} : vector<8x32xf32>, vector<32x64xf32>, vector<8x64xf32> -> vector<8x64xf32>
    %c0_17 = arith.constant 0 : index
    %c0_18 = arith.constant 0 : index
    %18 = vector.load %arg9[%c0_17, %c0_18] : memref<1x64xf32, #tpu.memory_space<vmem>>, vector<1x64xf32>
    %19 = vector.broadcast %18 : vector<1x64xf32> to vector<8x64xf32>
    %20 = arith.addf %17, %19 : vector<8x64xf32>
    %21 = vector.extract_strided_slice %15 {offsets = [0, 0], sizes = [8, 1], strides = [1, 1]} : vector<8x2xf32> to vector<8x1xf32>
    %c0_19 = arith.constant 0 : index
    %c0_20 = arith.constant 0 : index
    %22 = vector.load %arg10[%c0_19, %c0_20] : memref<1x64xf32, #tpu.memory_space<vmem>>, vector<1x64xf32>
    %23 = vector.broadcast %21 : vector<8x1xf32> to vector<8x64xf32>
    %24 = vector.broadcast %22 : vector<1x64xf32> to vector<8x64xf32>
    %25 = arith.mulf %23, %24 : vector<8x64xf32>
    %26 = arith.addf %20, %25 : vector<8x64xf32>
    %27 = vector.extract_strided_slice %15 {offsets = [0, 1], sizes = [8, 1], strides = [1, 1]} : vector<8x2xf32> to vector<8x1xf32>
    %c0_21 = arith.constant 0 : index
    %c0_22 = arith.constant 0 : index
    %28 = vector.load %arg11[%c0_21, %c0_22] : memref<1x64xf32, #tpu.memory_space<vmem>>, vector<1x64xf32>
    %29 = vector.broadcast %27 : vector<8x1xf32> to vector<8x64xf32>
    %30 = vector.broadcast %28 : vector<1x64xf32> to vector<8x64xf32>
    %31 = arith.mulf %29, %30 : vector<8x64xf32>
    %32 = arith.addf %26, %31 : vector<8x64xf32>
    %cst_23 = arith.constant 0.000000e+00 : f32
    %33 = vector.broadcast %cst_23 : f32 to vector<8x64xf32>
    %34 = arith.maximumf %32, %33 : vector<8x64xf32>
    %c0_24 = arith.constant 0 : index
    %c0_25 = arith.constant 0 : index
    %35 = vector.load %arg12[%c0_24, %c0_25] : memref<64x14xf32, #tpu.memory_space<vmem>>, vector<64x14xf32>
    %cst_26 = arith.constant dense<0.000000e+00> : vector<8x14xf32>
    %36 = tpu.matmul %34, %35, %cst_26 {dimension_numbers = #tpu.dot_dimension_numbers<[1], [0], [0], [1], [0, 0, 1, 1], [], []>} : vector<8x64xf32>, vector<64x14xf32>, vector<8x14xf32> -> vector<8x14xf32>
    %c0_27 = arith.constant 0 : index
    %c0_28 = arith.constant 0 : index
    %37 = vector.load %arg13[%c0_27, %c0_28] : memref<1x14xf32, #tpu.memory_space<vmem>>, vector<1x14xf32>
    %38 = vector.broadcast %37 : vector<1x14xf32> to vector<8x14xf32>
    %39 = arith.addf %36, %38 : vector<8x14xf32>
    %40 = tpu.iota {dimensions = array<i32: 1>} : vector<8x14xi32>
    %c9_i32 = arith.constant 9 : i32
    %41 = vector.broadcast %c9_i32 : i32 to vector<8x14xi32>
    %42 = arith.cmpi sgt, %40, %41 : vector<8x14xi32>
    %43 = arith.mulf %39, %39 : vector<8x14xf32>
    %cst_29 = arith.constant 0.000000e+00 : f32
    %44 = vector.broadcast %cst_29 : f32 to vector<8x14xf32>
    %45 = arith.select %42, %43, %44 : vector<8x14xi1>, vector<8x14xf32>
    %cst_30 = arith.constant dense<0.000000e+00> : vector<8xf32>
    %46 = vector.multi_reduction <add>, %45, %cst_30 [1] : vector<8x14xf32> to vector<8xf32>
    %47 = vector.shape_cast %46 : vector<8xf32> to vector<8x1xf32>
    %c0_31 = arith.constant 0 : index
    %c0_32 = arith.constant 0 : index
    %48 = memref.load %arg1[%c0_31, %c0_32] : memref<1x1xf32, #tpu.memory_space<smem>>
    %49 = vector.broadcast %48 : f32 to vector<8x1xf32>
    %50 = arith.addf %49, %47 : vector<8x1xf32>
    %51 = math.sqrt %50 : vector<8x1xf32>
    %c9_i32_33 = arith.constant 9 : i32
    %52 = vector.broadcast %c9_i32_33 : i32 to vector<8x14xi32>
    %53 = arith.cmpi eq, %40, %52 : vector<8x14xi32>
    %54 = vector.shape_cast %51 : vector<8x1xf32> to vector<8x1xf32>
    %55 = vector.broadcast %54 : vector<8x1xf32> to vector<8x14xf32>
    %56 = arith.select %53, %55, %39 : vector<8x14xi1>, vector<8x14xf32>
    %c0_34 = arith.constant 0 : index
    %c0_35 = arith.constant 0 : index
    %57 = vector.load %arg14[%c0_34, %c0_35] : memref<8x14xf32, #tpu.memory_space<vmem>>, vector<8x14xf32>
    tpu.vector_store %arg14[%c0_34, %c0_35], %56 {strides = array<i32>} : memref<8x14xf32, #tpu.memory_space<vmem>>, vector<8x14xf32>,
    return
  }
  func.func @transform_0(%arg0: i32) -> (i32, i32) {
    %c0_i32 = arith.constant 0 : i32
    %c0_i32_0 = arith.constant 0 : i32
    %c0_i32_1 = arith.constant 0 : i32
    return %c0_i32, %c0_i32_0 : i32, i32
  }
  func.func @transform_1(%arg0: i32) -> (i32, i32) {
    %c0_i32 = arith.constant 0 : i32
    %c0_i32_0 = arith.constant 0 : i32
    return %arg0, %c0_i32 : i32, i32
  }
  func.func @transform_2(%arg0: i32) -> (i32, i32) {
    %c0_i32 = arith.constant 0 : i32
    %c0_i32_0 = arith.constant 0 : i32
    return %arg0, %c0_i32 : i32, i32
  }
  func.func @transform_3(%arg0: i32) -> (i32, i32) {
    %c0_i32 = arith.constant 0 : i32
    %c0_i32_0 = arith.constant 0 : i32
    %c0_i32_1 = arith.constant 0 : i32
    return %c0_i32, %c0_i32_0 : i32, i32
  }
  func.func @transform_4(%arg0: i32) -> (i32, i32) {
    %c0_i32 = arith.constant 0 : i32
    %c0_i32_0 = arith.constant 0 : i32
    %c0_i32_1 = arith.constant 0 : i32
    return %c0_i32, %c0_i32_0 : i32, i32
  }
  func.func @transform_5(%arg0: i32) -> (i32, i32) {
    %c0_i32 = arith.constant 0 : i32
    %c0_i32_0 = arith.constant 0 : i32
    %c0_i32_1 = arith.constant 0 : i32
    return %c0_i32, %c0_i32_0 : i32, i32
  }
  func.func @transform_6(%arg0: i32) -> (i32, i32) {
    %c0_i32 = arith.constant 0 : i32
    %c0_i32_0 = arith.constant 0 : i32
    %c0_i32_1 = arith.constant 0 : i32
    return %c0_i32, %c0_i32_0 : i32, i32
  }
  func.func @transform_7(%arg0: i32) -> (i32, i32) {
    %c0_i32 = arith.constant 0 : i32
    %c0_i32_0 = arith.constant 0 : i32
    %c0_i32_1 = arith.constant 0 : i32
    return %c0_i32, %c0_i32_0 : i32, i32
  }
  func.func @transform_8(%arg0: i32) -> (i32, i32) {
    %c0_i32 = arith.constant 0 : i32
    %c0_i32_0 = arith.constant 0 : i32
    %c0_i32_1 = arith.constant 0 : i32
    return %c0_i32, %c0_i32_0 : i32, i32
  }
  func.func @transform_9(%arg0: i32) -> (i32, i32) {
    %c0_i32 = arith.constant 0 : i32
    %c0_i32_0 = arith.constant 0 : i32
    %c0_i32_1 = arith.constant 0 : i32
    return %c0_i32, %c0_i32_0 : i32, i32
  }
  func.func @transform_10(%arg0: i32) -> (i32, i32) {
    %c0_i32 = arith.constant 0 : i32
    %c0_i32_0 = arith.constant 0 : i32
    %c0_i32_1 = arith.constant 0 : i32
    return %c0_i32, %c0_i32_0 : i32, i32
  }
  func.func @transform_11(%arg0: i32) -> (i32, i32) {
    %c0_i32 = arith.constant 0 : i32
    %c0_i32_0 = arith.constant 0 : i32
    %c0_i32_1 = arith.constant 0 : i32
    return %c0_i32, %c0_i32_0 : i32, i32
  }
  func.func @transform_12(%arg0: i32) -> (i32, i32) {
    %c0_i32 = arith.constant 0 : i32
    %c0_i32_0 = arith.constant 0 : i32
    %c0_i32_1 = arith.constant 0 : i32
    return %c0_i32, %c0_i32_0 : i32, i32
  }
  func.func @transform_13(%arg0: i32) -> (i32, i32) {
    %c0_i32 = arith.constant 0 : i32
    %c0_i32_0 = arith.constant 0 : i32
    return %arg0, %c0_i32 : i32, i32
  }
}

</mosaic_0001>

<bundles_post_ra>
// kernel: tpu_custom_call.1
= control target key start
LH: loop header
LB: loop body
LE: loop exit
PB: predicated region body
PF: predicated region fallthrough
CT: control target
= control target key end

     0   :  { %19 = vsyncpa [#allocation4], 0  ;;  %s534_s0 = inlined_call_operand.<no memory space> [shape: f32[1,1], index: 0, kind: input, shape index: {}]   ;;  %s535_s1 = inlined_call_operand.hbm [shape: f32[8,16], index: 1, kind: input, shape index: {}]   ;;  %s536_s2 = inlined_call_operand.vmem [shape: f32[8,2], index: 2, kind: input, shape index: {}]   ;;  %s537_s3 = inlined_call_operand.vmem [shape: f32[16,32], index: 3, kind: input, shape index: {}]   ;;  %s538_s4 = inlined_call_operand.vmem [shape: f32[1,32], index: 4, kind: input, shape index: {}]   ;;  %s539_s5 = inlined_call_operand.vmem [shape: f32[32,32], index: 5, kind: input, shape index: {}]   ;;  %s540_s6 = inlined_call_operand.vmem [shape: f32[1,32], index: 6, kind: input, shape index: {}]   ;;  %s541_s7 = inlined_call_operand.vmem [shape: f32[32,64], index: 7, kind: input, shape index: {}]   ;;  %s542_s8 = inlined_call_operand.vmem [shape: f32[1,64], index: 8, kind: input, shape index: {}]   ;;  %s543_s9 = inlined_call_operand.vmem [shape: f32[1,64], index: 9, kind: input, shape index: {}]   ;;  %s544_s10 = inlined_call_operand.vmem [shape: f32[1,64], index: 10, kind: input, shape index: {}]   ;;  %s545_s11 = inlined_call_operand.vmem [shape: f32[64,14], index: 11, kind: input, shape index: {}]   ;;  %s546_s12 = inlined_call_operand.hbm [shape: f32[1,14], index: 12, kind: input, shape index: {}]   ;;  %s547_s13 = inlined_call_operand.hbm [shape: f32[8,14], index: 13, kind: output, shape index: {}]  }
   0x1   :  { %20 = vsyncpa [#allocation7], 0 }
   0x2   :  { %21 = vsyncpa [#allocation5], 0  ;;  %s29_s27 = sshll.u32 %s535_s1, 4  ;;  %s371_s28 = smov [#allocation3]   ;;  %s30_s27 = int_to_ptr.hbm [resolvable:$true] %s29_s27 }
   0x3   :  { %s31_s29 = sshll.u32 %s371_s28, 4  ;;  %s60_s15 = sshll.u32 %s546_s12, 4  ;;  %s32_s29 = int_to_ptr.vmem [resolvable:$true] %s31_s29  ;;  %s61_s15 = int_to_ptr.hbm [resolvable:$true] %s60_s15 }
   0x4   :  { %34 = dma.hbm_to_vmem [thread:$0]  %s30_s27, 128, %s32_s29, [#allocation4]  }
   0x5   :  { %s372_s16 = smov [#allocation6]  }
   0x6   :  { %s62_s17 = sshll.u32 %s372_s16, 4  ;;  %s63_s17 = int_to_ptr.vmem [resolvable:$true] %s62_s17 }
   0x7   :  { %65 = dma.hbm_to_vmem [thread:$0]  %s61_s15, 16, %s63_s17, [#allocation7]  }
   0x8   :  { %365 = dma.done.wait [#allocation4], 128  }
   0x9   :  { %366 = vsyncadd [#allocation4], 4294967168 }
   0xa   :  { %367 = dma.done.wait [#allocation7], 16  }
   0xb   :  { %368 = vsyncadd [#allocation7], 4294967280  ;;  %v76_v0 = vld [vmem:[%s537_s3 + $0x8] sm:$0xff]  ;;  %v75_v1 = vld [vmem:[%s537_s3] sm:$0xff]  ;;  %vm81_vm0 = vcmask 130048   ;;  %vm114_vm1 = vcmask 261120   ;;  %v229_v42 = vlaneseq  ;;  %v239_v50 = vstv %s534_s0 }
   0xc   :  { %99 = vmatpush.msra.mxu0 %v76_v0  ;;  %v74_v2 = vld [vmem:[#allocation3] sm:$0xff]  ;;  %v109_v3 = vld [vmem:[%s539_s5 + $0x18] sm:$0xff]  ;;  %v108_v4 = vld [vmem:[%s539_s5 + $0x10] sm:$0xff]  ;;  %v373_v16 = vmov 0   ;;  %v374_v17 = vmov 1   ;;  %vm205_vm2 = vcmask 523264  }
   0xd   :  { %130 = vmatpush.msra.mxu1 %v109_v3  ;;  %v107_v5 = vld [vmem:[%s539_s5 + $0x8] sm:$0xff]  ;;  %v106_v6 = vld [vmem:[%s539_s5] sm:$0xff]  ;;  %v143_v7 = vld [vmem:[%s541_s7 + $0x18] sm:$0xff]  ;;  %283 = vset.pattern.permute.xlu0 %v373_v16  ;;  %v230_v44 = vand.u32 127, %v229_v42  ;;  %vm234_vm4 = vcmask 113664   ;;  %s263_s20 = sshll.u32 %s547_s13, 4  ;;  %s264_s20 = int_to_ptr.hbm [resolvable:$true] %s263_s20 }
   0xe   :  { %100 = vmatpush.msra.mxu0 %v75_v1  ;;  %163 = vmatpush.msra.mxu2 %v143_v7  ;;  %v285_v8 = vld [vmem:[%s538_s4] ss:$0 sm:$0xff]  ;;  %v142_v12 = vld [vmem:[%s541_s7 + $0x10] sm:$0xff]  ;;  %v141_v13 = vld [vmem:[%s541_s7 + $0x8] sm:$0xff] }
   0xf   :  { %274 = vmatmul.msk.f32.vlgmr.msra.gmra.mxu0 %vm81_vm0, %v74_v2  ;;  %131 = vmatpush.msra.mxu1 %v108_v4  ;;  %v140_v14 = vld [vmem:[%s541_s7] sm:$0xff]  ;;  %v200_v22 = vld [vmem:[%s545_s11 + $0x38] sm:$0xff]  ;;  %v199_v23 = vld [vmem:[%s545_s11 + $0x30] sm:$0xff]  ;;  %vm231_vm3 = vcmp.gt.s32.totalorder %v230_v44, 9  ;;  %vm253_vm5 = vcmp.eq.s32.totalorder %v230_v44, 9 }
  0x10   :  { %164 = vmatpush.msra.mxu2 %v142_v12  ;;  %v139_v15 = vld [vmem:[%s536_s2] sm:$0xff]  ;;  %217 = vmatpush.msra.mxu3 %v200_v22  ;;  %v198_v24 = vld [vmem:[%s545_s11 + $0x28] sm:$0xff]  ;;  %v196_v26 = vld [vmem:[%s545_s11 + $0x18] sm:$0xff] }
  0x11   :  { %132 = vmatpush.msra.mxu1 %v107_v5  ;;  %174 = vperm.xlu0 %283, %v139_v15   ;;  %v286_v18 = vld [vmem:[%s540_s6] ss:$0 sm:$0xff]  ;;  %v195_v27 = vld [vmem:[%s545_s11 + $0x10] sm:$0xff]  ;;  %v194_v28 = vld [vmem:[%s545_s11 + $0x8] sm:$0xff] }
  0x12   :  { %165 = vmatpush.msra.mxu2 %v141_v13  ;;  %218 = vmatpush.msra.mxu3 %v199_v23  ;;  %v197_v25 = vld [vmem:[%s545_s11 + $0x20] sm:$0xff]  ;;  %v290_v43 = vld [vmem:[#allocation6] ss:$0 sm:$0xff] }
  0x13   :  { %133 = vmatpush.msra.mxu1 %v106_v6  ;;  %v193_v29 = vld [vmem:[%s545_s11] sm:$0xff] }
  0x14   :  { %166 = vmatpush.msra.mxu2 %v140_v14  ;;  %219 = vmatpush.msra.mxu3 %v198_v24  ;;  %v287_v31 = vld [vmem:[%s543_s9] ss:$0 sm:$0xff] }
  0x15   :  { %v288_v32 = vld [vmem:[%s542_s8] ss:$0 sm:$0xff] }
  0x16   :  { %220 = vmatpush.msra.mxu3 %v197_v25  ;;  %v289_v33 = vld [vmem:[%s544_s10] ss:$0 sm:$0xff]  ;;  %s375_s10 = smov [#allocation8]  }
  0x17   :  { %s261_s11 = sshll.u32 %s375_s10, 4  ;;  %s262_s11 = int_to_ptr.vmem [resolvable:$true] %s261_s11 }
  0x18   :  { %221 = vmatpush.msra.mxu3 %v196_v26 }
  0x19   :  { %284 = vset.pattern.permute.xlu0 %v374_v17 }
  0x1a   :  { %184 = vperm.xlu0 %284, %v139_v15   ;;  %222 = vmatpush.msra.mxu3 %v195_v27 }
  0x1c   :  { %223 = vmatpush.msra.mxu3 %v194_v28 }
  0x1e   :  { %224 = vmatpush.msra.mxu3 %v193_v29 }
  0x83   :  { %v175_v30 = vpop.permute.xlu0 %174 }
  0x84   :  { %v180_v36 = vmul.f32 %v287_v31, %v175_v30 }
  0x8c   :  { %v102_v9 = vpop.f32.mrf.mxu0  ;;  %v185_v34 = vpop.permute.xlu0 %184 }
  0x8d   :  { %v103_v10 = vadd.f32 %v285_v8, %v102_v9  ;;  %v190_v38 = vmul.f32 %v289_v33, %v185_v34 }
  0x8f   :  { %v105_v11 = vmax.f32 %v103_v10, 0.0 }
  0x91   :  { %275 = vmatmul.msk.f32.vlgmr.msra.gmra.mxu1 %vm114_vm1, %v105_v11 }
 0x10e   :  { %v135_v19 = vpop.f32.mrf.mxu1 }
 0x10f   :  { %v136_v20 = vadd.f32 %v286_v18, %v135_v19 }
 0x111   :  { %v138_v21 = vmax.f32 %v136_v20, 0.0 }
 0x113   :  { %276 = vmatmul.msk.f32.vlgmr.msra.gmra.mxu2 %vm114_vm1, %v138_v21 }
 0x196   :  { %v168_v35 = vpop.f32.mrf.mxu2 }
 0x197   :  { %v169_v37 = vadd.f32 %v288_v32, %v168_v35 }
 0x199   :  { %v181_v39 = vadd.f32 %v180_v36, %v169_v37 }
 0x19b   :  { %v191_v40 = vadd.f32 %v190_v38, %v181_v39 }
 0x19d   :  { %v192_v41 = vmax.f32 %v191_v40, 0.0 }
 0x19f   :  { %277 = vmatmul.msk.f32.vlgmr.msra.gmra.mxu3 %vm205_vm2, %v192_v41 }
 0x222   :  { %v226_v45 = vpop.f32.mrf.mxu3 }
 0x223   :  { %v227_v46 = vadd.f32 %v290_v43, %v226_v45 }
 0x225   :  { %v232_v47 = vmul.f32 %v227_v46, %v227_v46 }
 0x227   :  { %v233_v48 = vsel %vm231_vm3, %v232_v47, 0.0 }
 0x228   :  { %v235_v49 = vsel %vm234_vm4, %v233_v48, 0.0 }
 0x229   :  { %236 = vadd.xlane.f32.xlu1 %v235_v49 }
 0x29c   :  { %v237_v51 = vpop.xlane.xlu1 %236 }
 0x29d   :  { %v240_v52 = vadd.f32 %v239_v50, %v237_v51 }
 0x29f   :  { %291 = vrsqrt.f32 %v240_v52  ;;  %vm248_vm6 = vcmp.eq.f32.partialorder %v240_v52, inf  ;;  %v251_v60 = vand.u32 2147483648, %v240_v52  ;;  %vm250_vm7 = vcmp.eq.f32.partialorder %v240_v52, 0.0 }
 0x2a5   :  { %v292_v53 = vpop.eup %291 }
 0x2a6   :  { %v242_v54 = vmul.f32 %v292_v53, %v240_v52 }
 0x2a8   :  { %v243_v55 = vmul.f32 %v292_v53, %v242_v54 }
 0x2aa   :  { %v244_v56 = vmul.f32 0.5, %v243_v55 }
 0x2ac   :  { %v245_v57 = vsub.f32 1.5, %v244_v56 }
 0x2ae   :  { %v246_v58 = vmul.f32 %v292_v53, %v245_v57 }
 0x2b0   :  { %v247_v59 = vmul.f32 %v246_v58, %v240_v52 }
 0x2b2   :  { %v249_v61 = vsel %vm248_vm6, %v240_v52, %v247_v59 }
 0x2b3   :  { %v252_v62 = vsel %vm250_vm7, %v251_v60, %v249_v61 }
 0x2b4   :  { %v254_v63 = vsel %vm253_vm5, %v252_v62, %v227_v46 }
 0x2b5   :  { %255 = vst.msk [vmem:[#allocation8] sm:$0xff] %vm234_vm4, %v254_v63 }
 0x2b6   :  { %266 = dma.vmem_to_hbm [thread:$0]  %s262_s11, 128, %s264_s20, [#allocation5]  }
 0x2b7   :  { %369 = dma.done.wait [#allocation5], 128  }
 0x2b8   :  { %370 = vsyncadd [#allocation5], 4294967168 }
 0x2b9   :  { %271 = vsyncpa [#allocation4], 1 }
 0x2ba   :  { %272 = vsyncpa [#allocation7], 1 }
 0x2bb   :  { %273 = vsyncpa [#allocation5], 1 }

</bundles_post_ra>
